<compile_context>
chip_gen: v6e
topology: v6e:2x2x1
jax: 0.10.0
libtpu: 0.0.40
codegen_flags: <defaults>
</compile_context>

<pallas_src>
import functools

import jax
import jax.numpy as jnp
from jax.experimental import pallas as pl
from jax.experimental.pallas import tpu as pltpu

LANE = 128


def _round_up(v, m):
    return ((v + m - 1) // m) * m


def _fused_gcn_kernel(a_ref, x_ref, w1_ref, w2_ref, b1_ref, b2_ref,
                      o_ref, h_ref, acc_ref, *, tm, tk):
    """Fused 2-layer GCN step for grid point (layer, i, k).

    a_ref : (tm, tk)  bf16   A_hat tile at (row block i, col block k)
    x_ref : (tk, Fp)  bf16   input-feature rows for block k (layer 0 only)
    w*_ref: (Fp, Fp)  bf16   padded weights
    b*_ref: (1, Fp)   f32    padded biases
    o_ref : (tm, Fp)  f32    output row block (written at layer 1, k == last)
    h_ref : (Np, Fp)  bf16   persistent VMEM scratch holding hidden H
    acc   : (tm, Fp)  f32    reduction accumulator
    """
    layer = pl.program_id(0)
    i = pl.program_id(1)
    k = pl.program_id(2)
    n_k = pl.num_programs(2)

    @pl.when(k == 0)
    def _init_acc():
        acc_ref[...] = jnp.zeros_like(acc_ref)

    # ---- layer 0: accumulate A[i,k] @ (X[k] @ W1) -------------------------
    @pl.when(layer == 0)
    def _layer0_step():
        xw = jnp.dot(x_ref[...], w1_ref[...],
                     preferred_element_type=jnp.float32)
        acc_ref[...] += jnp.dot(a_ref[...], xw.astype(jnp.bfloat16),
                                preferred_element_type=jnp.float32)

    @pl.when((layer == 0) & (k == n_k - 1))
    def _layer0_finish():
        h = jnp.maximum(acc_ref[...] + b1_ref[...], 0.0)   # bias + ReLU (f32)
        # F.dropout(p=0.5, training=False) == identity in eval mode.
        row = pl.multiple_of(i * tm, tm)
        h_ref[pl.ds(row, tm), :] = h.astype(h_ref.dtype)

    # ---- layer 1: accumulate A[i,k] @ (H[k] @ W2) -------------------------
    @pl.when(layer == 1)
    def _layer1_step():
        row_k = pl.multiple_of(k * tk, tk)
        hk = h_ref[pl.ds(row_k, tk), :]
        hw = jnp.dot(hk, w2_ref[...], preferred_element_type=jnp.float32)
        acc_ref[...] += jnp.dot(a_ref[...], hw.astype(jnp.bfloat16),
                                preferred_element_type=jnp.float32)

    @pl.when((layer == 1) & (k == n_k - 1))
    def _layer1_finish():
        o_ref[...] = (acc_ref[...] + b2_ref[...]).astype(o_ref.dtype)


def fused_gcn(a_p, x_p, w1_p, w2_p, b1_p, b2_p, *, tm=128, tk=128):
    """One pallas_call for both GCN layers on padded, lane-dense operands."""
    np_, _ = a_p.shape
    fp = x_p.shape[1]
    n_i = np_ // tm
    n_k = np_ // tk

    kernel = functools.partial(_fused_gcn_kernel, tm=tm, tk=tk)

    # 2 layers x (projection + aggregation) matmuls.
    flops = 2 * (2 * np_ * np_ * fp + 2 * np_ * fp * fp)
    bytes_accessed = (2 * np_ * np_ * 2          # A_hat read once per layer (bf16)
                      + np_ * fp * 2             # X (bf16)
                      + 2 * fp * fp * 2          # W1, W2
                      + np_ * fp * 4)            # output (f32)

    return pl.pallas_call(
        kernel,
        out_shape=jax.ShapeDtypeStruct((np_, fp), jnp.float32),
        grid=(2, n_i, n_k),
        in_specs=[
            # A_hat tile stream (the roofline term): row block i, col block k.
            pl.BlockSpec((tm, tk), lambda l, i, k: (i, k)),
            # X rows for reduction block k; pinned to block 0 during layer 1
            # so it is not re-DMA'd when it is unused.
            pl.BlockSpec((tk, fp), lambda l, i, k: ((1 - l) * k, 0)),
            pl.BlockSpec((fp, fp), lambda l, i, k: (0, 0)),   # W1 (resident)
            pl.BlockSpec((fp, fp), lambda l, i, k: (0, 0)),   # W2 (resident)
            pl.BlockSpec((1, fp), lambda l, i, k: (0, 0)),    # b1
            pl.BlockSpec((1, fp), lambda l, i, k: (0, 0)),    # b2
        ],
        # During layer 0 the output block index is pinned to 0 (nothing is
        # written); during layer 1 it follows the row block i (accumulator
        # pattern: stored once at k == last).
        out_specs=pl.BlockSpec((tm, fp), lambda l, i, k: (l * i, 0)),
        scratch_shapes=[
            pltpu.VMEM((np_, fp), jnp.bfloat16),   # hidden H, resident in VMEM
            pltpu.VMEM((tm, fp), jnp.float32),     # reduction accumulator
        ],
        compiler_params=pltpu.CompilerParams(
            # layer/row/reduction axes all "arbitrary": layer 1 reads the
            # VMEM-resident H produced by layer 0, so sequential order is
            # required (trades v7x megacore sharding for fusion).
            dimension_semantics=("arbitrary", "arbitrary", "arbitrary"),
            vmem_limit_bytes=32 * 1024 * 1024,
        ),
        cost_estimate=pl.CostEstimate(
            flops=flops, transcendentals=0, bytes_accessed=bytes_accessed),
    )(a_p, x_p, w1_p, w2_p, b1_p, b2_p)


def normalized_adjacency(edge_index, num_nodes):
    """Dense D^{-1/2}(A+I)D^{-1/2} from (2, E) edge_index.  Plain-JAX glue.

    Duplicate edges accumulate (scatter-add) and self-loops are only added
    where missing, matching torch_geometric's gcn_norm behaviour.
    """
    src, dst = edge_index[0], edge_index[1]
    a = jnp.zeros((num_nodes, num_nodes), jnp.float32)
    a = a.at[dst, src].add(1.0)                       # message j -> i: row i, col j
    diag = jnp.diagonal(a)
    a = a + jnp.diag(jnp.where(diag == 0, 1.0, 0.0))  # add only missing self-loops
    deg = jnp.sum(a, axis=1)
    d_inv_sqrt = jnp.where(deg > 0, jax.lax.rsqrt(deg), 0.0)
    return d_inv_sqrt[:, None] * a * d_inv_sqrt[None, :]


def gcn_forward(x, edge_index, params, *, tm=128, tk=128):
    """Full GCN forward: conv1 -> relu -> dropout(eval) -> conv2 (fused)."""
    n, f_in = x.shape
    hid = params["w1"].shape[1]
    f_out = params["w2"].shape[1]

    a_hat = normalized_adjacency(edge_index, n)

    # Pad nodes to the tile size and feature dims to a lane-dense width so
    # all MXU operands / stores are full (8,128) tiles.  Zero padding is
    # exact: padded rows/cols of A_hat and padded weight/bias entries are 0.
    np_ = _round_up(n, max(tm, tk))
    fp = _round_up(max(f_in, hid, f_out, 1), LANE)

    a_p = jnp.zeros((np_, np_), jnp.bfloat16).at[:n, :n].set(
        a_hat.astype(jnp.bfloat16))
    x_p = jnp.zeros((np_, fp), jnp.bfloat16).at[:n, :f_in].set(
        x.astype(jnp.bfloat16))
    w1_p = jnp.zeros((fp, fp), jnp.bfloat16).at[:f_in, :hid].set(
        params["w1"].astype(jnp.bfloat16))
    w2_p = jnp.zeros((fp, fp), jnp.bfloat16).at[:hid, :f_out].set(
        params["w2"].astype(jnp.bfloat16))
    b1_p = jnp.zeros((1, fp), jnp.float32).at[0, :hid].set(params["b1"])
    b2_p = jnp.zeros((1, fp), jnp.float32).at[0, :f_out].set(params["b2"])

    out_p = fused_gcn(a_p, x_p, w1_p, w2_p, b1_p, b2_p, tm=tm, tk=tk)
    return out_p[:n, :f_out]


def init_params(key, input_dim, hidden_dim, output_dim):
    k1, k2 = jax.random.split(key)

    def glorot(k, fan_in, fan_out):
        limit = jnp.sqrt(6.0 / (fan_in + fan_out))
        return jax.random.uniform(k, (fan_in, fan_out), jnp.float32,
                                  minval=-limit, maxval=limit)

    return {
        "w1": glorot(k1, input_dim, hidden_dim),
        "b1": jnp.zeros((hidden_dim,), jnp.float32),
        "w2": glorot(k2, hidden_dim, output_dim),
        "b2": jnp.zeros((output_dim,), jnp.float32),
    }


def _reference_forward(x, edge_index, params):
    """Pure-JAX reference with matching bf16 operand precision."""
    n = x.shape[0]
    a = normalized_adjacency(edge_index, n).astype(jnp.bfloat16).astype(jnp.float32)
    xb = x.astype(jnp.bfloat16).astype(jnp.float32)
    w1 = params["w1"].astype(jnp.bfloat16).astype(jnp.float32)
    w2 = params["w2"].astype(jnp.bfloat16).astype(jnp.float32)
    xw = (xb @ w1).astype(jnp.bfloat16).astype(jnp.float32)
    h = jnp.maximum(a @ xw + params["b1"][None, :], 0.0)
    hb = h.astype(jnp.bfloat16).astype(jnp.float32)
    hw = (hb @ w2).astype(jnp.bfloat16).astype(jnp.float32)
    return a @ hw + params["b2"][None, :]


if __name__ == "__main__":
    key = jax.random.PRNGKey(0)
    k_x, k_e, k_p = jax.random.split(key, 3)

    num_nodes = 16
    num_edges = 32
    input_dim, hidden_dim, output_dim = 8, 32, 4

    x = jax.random.normal(k_x, (num_nodes, input_dim), jnp.float32)
    edge_index = jax.random.randint(k_e, (2, num_edges), 0, num_nodes,
                                    dtype=jnp.int32)
    params = init_params(k_p, input_dim, hidden_dim, output_dim)

    out = jax.jit(gcn_forward)(x, edge_index, params)
    jax.block_until_ready(out)

    assert out.shape == (num_nodes, output_dim), out.shape
    assert out.dtype == jnp.float32
    assert bool(jnp.all(jnp.isfinite(out)))

    ref = _reference_forward(x, edge_index, params)
    assert bool(jnp.allclose(out, ref, rtol=5e-2, atol=5e-2)), (out, ref)

    print("KERNEL_OK")
</pallas_src>

<mosaic_0001>
module attributes {stable_mosaic.version = 11 : i64} {
  func.func private @main(%arg0: i32) attributes {dimension_semantics = [#tpu.dimension_semantics<core_parallel>], iteration_bounds = array<i64: 2>, tpu.core_type = #tpu.core_type<sc_scalar_subcore>, window_params = []} {
    return
  }
}

module attributes {stable_mosaic.version = 11 : i64} {
  func.func private @main(%arg0: i32) attributes {dimension_semantics = [#tpu.dimension_semantics<core_parallel>], iteration_bounds = array<i64: 2>, tpu.core_type = #tpu.core_type<sc_scalar_subcore>, window_params = []} {
    return
  }
}

module attributes {stable_mosaic.version = 11 : i64} {
  func.func @_fused_gcn_kernel(%arg0: i32, %arg1: i32, %arg2: i32, %arg3: memref<128x128xbf16, #tpu.memory_space<vmem>>, %arg4: memref<128x128xbf16, #tpu.memory_space<vmem>>, %arg5: memref<128x128xbf16, #tpu.memory_space<vmem>>, %arg6: memref<128x128xbf16, #tpu.memory_space<vmem>>, %arg7: memref<1x128xf32, #tpu.memory_space<vmem>>, %arg8: memref<1x128xf32, #tpu.memory_space<vmem>>, %arg9: memref<128x128xf32, #tpu.memory_space<vmem>>, %arg10: memref<128x128xbf16, #tpu.memory_space<vmem>>, %arg11: memref<128x128xf32, #tpu.memory_space<vmem>>) attributes {dimension_semantics = [#tpu.dimension_semantics<arbitrary>, #tpu.dimension_semantics<arbitrary>, #tpu.dimension_semantics<arbitrary>], iteration_bounds = array<i64: 2, 1, 1>, scalar_prefetch = 0 : i64, scratch_operands = 2 : i64, tpu.core_type = #tpu.core_type<tc>, window_params = [{transform_indices = @transform_0, window_bounds = array<i64: 128, 128>}, {transform_indices = @transform_1, window_bounds = array<i64: 128, 128>}, {pipeline_mode = #tpu.pipeline_mode<synchronous>, transform_indices = @transform_2, window_bounds = array<i64: 128, 128>}, {pipeline_mode = #tpu.pipeline_mode<synchronous>, transform_indices = @transform_3, window_bounds = array<i64: 128, 128>}, {pipeline_mode = #tpu.pipeline_mode<synchronous>, transform_indices = @transform_4, window_bounds = array<i64: 1, 128>}, {pipeline_mode = #tpu.pipeline_mode<synchronous>, transform_indices = @transform_5, window_bounds = array<i64: 1, 128>}, {transform_indices = @transform_6, window_bounds = array<i64: 128, 128>}]} {
    %c0_i32 = arith.constant 0 : i32
    %0 = arith.cmpi eq, %arg2, %c0_i32 : i32
    %1 = arith.extui %0 : i1 to i32
    %c0_i32_0 = arith.constant 0 : i32
    %2 = arith.cmpi ne, %1, %c0_i32_0 : i32
    scf.if %2 {
      %cst = arith.constant 0.000000e+00 : f32
      %19 = vector.broadcast %cst : f32 to vector<128x128xf32>
      %c0 = arith.constant 0 : index
      %c0_10 = arith.constant 0 : index
      %20 = vector.load %arg11[%c0, %c0_10] : memref<128x128xf32, #tpu.memory_space<vmem>>, vector<128x128xf32>
      tpu.vector_store %arg11[%c0, %c0_10], %19 {strides = array<i32>} : memref<128x128xf32, #tpu.memory_space<vmem>>, vector<128x128xf32>,
    } else {
    }
    %c0_i32_1 = arith.constant 0 : i32
    %3 = arith.cmpi eq, %arg0, %c0_i32_1 : i32
    %4 = arith.extui %3 : i1 to i32
    %c0_i32_2 = arith.constant 0 : i32
    %5 = arith.cmpi ne, %4, %c0_i32_2 : i32
    scf.if %5 {
      %c0 = arith.constant 0 : index
      %c0_10 = arith.constant 0 : index
      %19 = vector.load %arg4[%c0, %c0_10] : memref<128x128xbf16, #tpu.memory_space<vmem>>, vector<128x128xbf16>
      %c0_11 = arith.constant 0 : index
      %c0_12 = arith.constant 0 : index
      %20 = vector.load %arg5[%c0_11, %c0_12] : memref<128x128xbf16, #tpu.memory_space<vmem>>, vector<128x128xbf16>
      %cst = arith.constant dense<0.000000e+00> : vector<128x128xf32>
      %21 = tpu.matmul %19, %20, %cst {dimension_numbers = #tpu.dot_dimension_numbers<[1], [0], [0], [1], [0, 0, 1, 1], [], []>} : vector<128x128xbf16>, vector<128x128xbf16>, vector<128x128xf32> -> vector<128x128xf32>
      %c0_13 = arith.constant 0 : index
      %c0_14 = arith.constant 0 : index
      %22 = vector.load %arg11[%c0_13, %c0_14] : memref<128x128xf32, #tpu.memory_space<vmem>>, vector<128x128xf32>
      %c0_15 = arith.constant 0 : index
      %c0_16 = arith.constant 0 : index
      %23 = vector.load %arg3[%c0_15, %c0_16] : memref<128x128xbf16, #tpu.memory_space<vmem>>, vector<128x128xbf16>
      %24 = arith.truncf %21 : vector<128x128xf32> to vector<128x128xbf16>
      %cst_17 = arith.constant dense<0.000000e+00> : vector<128x128xf32>
      %25 = tpu.matmul %23, %24, %cst_17 {dimension_numbers = #tpu.dot_dimension_numbers<[1], [0], [0], [1], [0, 0, 1, 1], [], []>} : vector<128x128xbf16>, vector<128x128xbf16>, vector<128x128xf32> -> vector<128x128xf32>
      %26 = arith.addf %22, %25 : vector<128x128xf32>
      %c0_18 = arith.constant 0 : index
      %c0_19 = arith.constant 0 : index
      %27 = vector.load %arg11[%c0_18, %c0_19] : memref<128x128xf32, #tpu.memory_space<vmem>>, vector<128x128xf32>
      tpu.vector_store %arg11[%c0_18, %c0_19], %26 {strides = array<i32>} : memref<128x128xf32, #tpu.memory_space<vmem>>, vector<128x128xf32>,
    } else {
    }
    %c0_i32_3 = arith.constant 0 : i32
    %6 = arith.cmpi eq, %arg0, %c0_i32_3 : i32
    %c0_i32_4 = arith.constant 0 : i32
    %7 = arith.cmpi eq, %arg2, %c0_i32_4 : i32
    %8 = arith.andi %6, %7 : i1
    %9 = arith.extui %8 : i1 to i32
    %c0_i32_5 = arith.constant 0 : i32
    %10 = arith.cmpi ne, %9, %c0_i32_5 : i32
    scf.if %10 {
      %c0 = arith.constant 0 : index
      %c0_10 = arith.constant 0 : index
      %19 = vector.load %arg11[%c0, %c0_10] : memref<128x128xf32, #tpu.memory_space<vmem>>, vector<128x128xf32>
      %c0_11 = arith.constant 0 : index
      %c0_12 = arith.constant 0 : index
      %20 = vector.load %arg7[%c0_11, %c0_12] : memref<1x128xf32, #tpu.memory_space<vmem>>, vector<1x128xf32>
      %21 = vector.broadcast %20 : vector<1x128xf32> to vector<128x128xf32>
      %22 = arith.addf %19, %21 : vector<128x128xf32>
      %cst = arith.constant 0.000000e+00 : f32
      %23 = vector.broadcast %cst : f32 to vector<128x128xf32>
      %24 = arith.maximumf %22, %23 : vector<128x128xf32>
      %c128_i32 = arith.constant 128 : i32
      %25 = arith.muli %arg1, %c128_i32 : i32
      %26 = tpu.assume_multiple %25, 128 : i32
      %27 = arith.truncf %24 : vector<128x128xf32> to vector<128x128xbf16>
      %28 = arith.index_cast %26 : i32 to index
      %c0_13 = arith.constant 0 : index
      %29 = vector.load %arg10[%28, %c0_13] : memref<128x128xbf16, #tpu.memory_space<vmem>>, vector<128x128xbf16>
      tpu.vector_store %arg10[%28, %c0_13], %27 {strides = array<i32>} : memref<128x128xbf16, #tpu.memory_space<vmem>>, vector<128x128xbf16>,
    } else {
    }
    %c1_i32 = arith.constant 1 : i32
    %11 = arith.cmpi eq, %arg0, %c1_i32 : i32
    %12 = arith.extui %11 : i1 to i32
    %c0_i32_6 = arith.constant 0 : i32
    %13 = arith.cmpi ne, %12, %c0_i32_6 : i32
    scf.if %13 {
      %c128_i32 = arith.constant 128 : i32
      %19 = arith.muli %arg2, %c128_i32 : i32
      %20 = tpu.assume_multiple %19, 128 : i32
      %21 = arith.index_cast %20 : i32 to index
      %c0 = arith.constant 0 : index
      %22 = vector.load %arg10[%21, %c0] : memref<128x128xbf16, #tpu.memory_space<vmem>>, vector<128x128xbf16>
      %c0_10 = arith.constant 0 : index
      %c0_11 = arith.constant 0 : index
      %23 = vector.load %arg6[%c0_10, %c0_11] : memref<128x128xbf16, #tpu.memory_space<vmem>>, vector<128x128xbf16>
      %cst = arith.constant dense<0.000000e+00> : vector<128x128xf32>
      %24 = tpu.matmul %22, %23, %cst {dimension_numbers = #tpu.dot_dimension_numbers<[1], [0], [0], [1], [0, 0, 1, 1], [], []>} : vector<128x128xbf16>, vector<128x128xbf16>, vector<128x128xf32> -> vector<128x128xf32>
      %c0_12 = arith.constant 0 : index
      %c0_13 = arith.constant 0 : index
      %25 = vector.load %arg11[%c0_12, %c0_13] : memref<128x128xf32, #tpu.memory_space<vmem>>, vector<128x128xf32>
      %c0_14 = arith.constant 0 : index
      %c0_15 = arith.constant 0 : index
      %26 = vector.load %arg3[%c0_14, %c0_15] : memref<128x128xbf16, #tpu.memory_space<vmem>>, vector<128x128xbf16>
      %27 = arith.truncf %24 : vector<128x128xf32> to vector<128x128xbf16>
      %cst_16 = arith.constant dense<0.000000e+00> : vector<128x128xf32>
      %28 = tpu.matmul %26, %27, %cst_16 {dimension_numbers = #tpu.dot_dimension_numbers<[1], [0], [0], [1], [0, 0, 1, 1], [], []>} : vector<128x128xbf16>, vector<128x128xbf16>, vector<128x128xf32> -> vector<128x128xf32>
      %29 = arith.addf %25, %28 : vector<128x128xf32>
      %c0_17 = arith.constant 0 : index
      %c0_18 = arith.constant 0 : index
      %30 = vector.load %arg11[%c0_17, %c0_18] : memref<128x128xf32, #tpu.memory_space<vmem>>, vector<128x128xf32>
      tpu.vector_store %arg11[%c0_17, %c0_18], %29 {strides = array<i32>} : memref<128x128xf32, #tpu.memory_space<vmem>>, vector<128x128xf32>,
    } else {
    }
    %c1_i32_7 = arith.constant 1 : i32
    %14 = arith.cmpi eq, %arg0, %c1_i32_7 : i32
    %c0_i32_8 = arith.constant 0 : i32
    %15 = arith.cmpi eq, %arg2, %c0_i32_8 : i32
    %16 = arith.andi %14, %15 : i1
    %17 = arith.extui %16 : i1 to i32
    %c0_i32_9 = arith.constant 0 : i32
    %18 = arith.cmpi ne, %17, %c0_i32_9 : i32
    scf.if %18 {
      %c0 = arith.constant 0 : index
      %c0_10 = arith.constant 0 : index
      %19 = vector.load %arg11[%c0, %c0_10] : memref<128x128xf32, #tpu.memory_space<vmem>>, vector<128x128xf32>
      %c0_11 = arith.constant 0 : index
      %c0_12 = arith.constant 0 : index
      %20 = vector.load %arg8[%c0_11, %c0_12] : memref<1x128xf32, #tpu.memory_space<vmem>>, vector<1x128xf32>
      %21 = vector.broadcast %20 : vector<1x128xf32> to vector<128x128xf32>
      %22 = arith.addf %19, %21 : vector<128x128xf32>
      %c0_13 = arith.constant 0 : index
      %c0_14 = arith.constant 0 : index
      %23 = vector.load %arg9[%c0_13, %c0_14] : memref<128x128xf32, #tpu.memory_space<vmem>>, vector<128x128xf32>
      tpu.vector_store %arg9[%c0_13, %c0_14], %22 {strides = array<i32>} : memref<128x128xf32, #tpu.memory_space<vmem>>, vector<128x128xf32>,
    } else {
    }
    return
  }
  func.func @transform_0(%arg0: i32, %arg1: i32, %arg2: i32) -> (i32, i32) {
    %c0_i32 = arith.constant 0 : i32
    return %arg1, %arg2 : i32, i32
  }
  func.func @transform_1(%arg0: i32, %arg1: i32, %arg2: i32) -> (i32, i32) {
    %c1_i32 = arith.constant 1 : i32
    %0 = arith.subi %c1_i32, %arg0 : i32
    %1 = arith.muli %0, %arg2 : i32
    %c0_i32 = arith.constant 0 : i32
    %c0_i32_0 = arith.constant 0 : i32
    return %1, %c0_i32 : i32, i32
  }
  func.func @transform_2(%arg0: i32, %arg1: i32, %arg2: i32) -> (i32, i32) {
    %c0_i32 = arith.constant 0 : i32
    %c0_i32_0 = arith.constant 0 : i32
    %c0_i32_1 = arith.constant 0 : i32
    return %c0_i32, %c0_i32_0 : i32, i32
  }
  func.func @transform_3(%arg0: i32, %arg1: i32, %arg2: i32) -> (i32, i32) {
    %c0_i32 = arith.constant 0 : i32
    %c0_i32_0 = arith.constant 0 : i32
    %c0_i32_1 = arith.constant 0 : i32
    return %c0_i32, %c0_i32_0 : i32, i32
  }
  func.func @transform_4(%arg0: i32, %arg1: i32, %arg2: i32) -> (i32, i32) {
    %c0_i32 = arith.constant 0 : i32
    %c0_i32_0 = arith.constant 0 : i32
    %c0_i32_1 = arith.constant 0 : i32
    return %c0_i32, %c0_i32_0 : i32, i32
  }
  func.func @transform_5(%arg0: i32, %arg1: i32, %arg2: i32) -> (i32, i32) {
    %c0_i32 = arith.constant 0 : i32
    %c0_i32_0 = arith.constant 0 : i32
    %c0_i32_1 = arith.constant 0 : i32
    return %c0_i32, %c0_i32_0 : i32, i32
  }
  func.func @transform_6(%arg0: i32, %arg1: i32, %arg2: i32) -> (i32, i32) {
    %0 = arith.muli %arg0, %arg1 : i32
    %c0_i32 = arith.constant 0 : i32
    %c0_i32_0 = arith.constant 0 : i32
    return %0, %c0_i32 : i32, i32
  }
}

</mosaic_0001>

<bundles_post_ra>
// kernel: gcn_forward.1
= control target key start
LH: loop header
LB: loop body
LE: loop exit
PB: predicated region body
PF: predicated region fallthrough
CT: control target
= control target key end

     0   :  { %s2011_s21 = smov 0   ;;  %s2013_s22 = smov 0   ;;  %s2222_s0 = inlined_call_operand.vmem [shape: bf16[128,128], index: 0, kind: input, shape index: {}]   ;;  %s2223_s1 = inlined_call_operand.vmem [shape: bf16[128,128], index: 1, kind: input, shape index: {}]   ;;  %s2224_s2 = inlined_call_operand.vmem [shape: bf16[128,128], index: 2, kind: input, shape index: {}]   ;;  %s2225_s3 = inlined_call_operand.vmem [shape: bf16[128,128], index: 3, kind: input, shape index: {}]   ;;  %s2226_s4 = inlined_call_operand.vmem [shape: f32[1,128], index: 4, kind: input, shape index: {}]   ;;  %s2227_s5 = inlined_call_operand.vmem [shape: f32[1,128], index: 5, kind: input, shape index: {}]   ;;  %s2228_s6 = inlined_call_operand.vmem [shape: f32[128,128], index: 6, kind: output, shape index: {}]  }
   0x1   :  { %s2015_s23 = smov 0  }
   0x2 LB: > { %s35_s24 = sadd.s32 1, %s1969_s22  ;;  %p1546_p0 = scmp.ge.s32.totalorder %s1973_s23, 1  ;;  %s1973_s23 = sphi %s2015_s23, %s16_s23   ;;  %s1969_s22 = sphi %s2013_s22, %s2230_s22   ;;  %s1965_s21 = sphi %s2011_s21, %s2229_s21  }
   0x3   : > { %p37_p1 = scmp.ge.s32.totalorder %s35_s24, 2  ;;  %p258_p2 = scmp.lt.s32.totalorder %s1973_s23, 3 }
   0x5   : > { %s2232_s24 = smov (%p37_p1, %s35_s24), 0  ;;  %p259_p3 = pnand %p1546_p0, %p258_p2 }
   0x6   : > { %p347_p4 = scmp.eq.s32.totalorder (!%p259_p3), %s1965_s21, 0  ;;  %p1547_p5 = scmp.ne.s32.totalorder (!%p259_p3), %s1965_s21, 0 }
   0x7   : > { %262 = sbr.rel (%p259_p3) target bundleno = 1084 (0x43c), region = 44 }
   0xc   : > { %v1975_v0 = vmov 0.0  }
   0xd   : > { %331 = vst [vmem:[#allocation3 + $0x30] sm:$0xff] %v1975_v0  ;;  %332 = vst [vmem:[#allocation3] sm:$0xff] %v1975_v0 }
   0xe   : > { %333 = vst [vmem:[#allocation3 + $0x58] sm:$0xff] %v1975_v0  ;;  %334 = vst [vmem:[#allocation3 + $0x18] sm:$0xff] %v1975_v0 }
   0xf   : > { %335 = vst [vmem:[#allocation3 + $0x50] sm:$0xff] %v1975_v0  ;;  %336 = vst [vmem:[#allocation3 + $0x68] sm:$0xff] %v1975_v0 }
  0x10   : > { %337 = vst [vmem:[#allocation3 + $0x8] sm:$0xff] %v1975_v0  ;;  %338 = vst [vmem:[#allocation3 + $0x48] sm:$0xff] %v1975_v0  ;;  %350 = sbr.rel (%p1547_p5) target bundleno = 535 (0x217), region = 52 }
  0x11   : > { %339 = vst [vmem:[#allocation3 + $0x40] sm:$0xff] %v1975_v0  ;;  %340 = vst [vmem:[#allocation3 + $0x20] sm:$0xff] %v1975_v0 }
  0x12   : > { %341 = vst [vmem:[#allocation3 + $0x10] sm:$0xff] %v1975_v0  ;;  %342 = vst [vmem:[#allocation3 + $0x38] sm:$0xff] %v1975_v0 }
  0x13   : > { %343 = vst [vmem:[#allocation3 + $0x60] sm:$0xff] %v1975_v0  ;;  %344 = vst [vmem:[#allocation3 + $0x70] sm:$0xff] %v1975_v0 }
  0x14   : > { %345 = vst [vmem:[#allocation3 + $0x78] sm:$0xff] %v1975_v0  ;;  %346 = vst [vmem:[#allocation3 + $0x28] sm:$0xff] %v1975_v0 }
  0x15   : > { %v1903_v1 = vld [vmem:[%s2224_s2 + $0x38] sm:$0xff]   ;;  %v1904_v2 = vld [vmem:[%s2224_s2 + $0x30] sm:$0xff]   ;;  %v1905_v3 = vld [vmem:[%s2224_s2 + $0x28] sm:$0xff]  }
  0x16   : > { %1750 = vmatprep.subr.bf16.mxu0 %v1903_v1  ;;  %v1906_v4 = vld [vmem:[%s2224_s2 + $0x20] sm:$0xff]   ;;  %v1907_v6 = vld [vmem:[%s2224_s2 + $0x18] sm:$0xff]   ;;  %v1908_v7 = vld [vmem:[%s2224_s2 + $0x10] sm:$0xff]  }
  0x17   : > { %1751 = vmatpush3.bf16.msra.mxu0 %v1903_v1  ;;  %v1911_v5 = vld [vmem:[%s2223_s1] sm:$0xff]   ;;  %v1909_v8 = vld [vmem:[%s2224_s2 + $0x8] sm:$0xff]   ;;  %v1913_v11 = vld [vmem:[%s2223_s1 + $0x10] sm:$0xff]  }
  0x18   : > { %1752 = vmatprep.subr.bf16.mxu0 %v1904_v2  ;;  %1766 = vmatprep.mubr.bf16.mxu0 %v1911_v5  ;;  %v1910_v9 = vld [vmem:[%s2224_s2] sm:$0xff]   ;;  %v1912_v10 = vld [vmem:[%s2223_s1 + $0x8] sm:$0xff]   ;;  %v1914_v12 = vld [vmem:[%s2223_s1 + $0x18] sm:$0xff]  }
  0x19   : > { %v1915_v13 = vld [vmem:[%s2223_s1 + $0x20] sm:$0xff]   ;;  %v1916_v14 = vld [vmem:[%s2223_s1 + $0x28] sm:$0xff]   ;;  %v1917_v15 = vld [vmem:[%s2223_s1 + $0x30] sm:$0xff]  }
  0x1a   : > { %v1918_v16 = vld [vmem:[%s2223_s1 + $0x38] sm:$0xff]   ;;  %v1919_v17 = vld [vmem:[%s2222_s0] sm:$0xff]   ;;  %v1920_v42 = vld [vmem:[%s2222_s0 + $0x8] sm:$0xff]  }
  0x1b   : > { %1753 = vmatpush3.bf16.msra.mxu0 %v1904_v2  ;;  %1798 = vmatprep.mubr.bf16.mxu1 %v1919_v17  ;;  %v1921_v43 = vld [vmem:[%s2222_s0 + $0x10] sm:$0xff]   ;;  %v1922_v44 = vld [vmem:[%s2222_s0 + $0x18] sm:$0xff]   ;;  %v1923_v45 = vld [vmem:[%s2222_s0 + $0x20] sm:$0xff]  }
  0x1c   : > { %1754 = vmatprep.subr.bf16.mxu0 %v1905_v3  ;;  %v1924_v46 = vld [vmem:[%s2222_s0 + $0x28] sm:$0xff]   ;;  %v1925_v47 = vld [vmem:[%s2222_s0 + $0x30] sm:$0xff]   ;;  %v1926_v48 = vld [vmem:[%s2222_s0 + $0x38] sm:$0xff]  }
  0x1d   : > { %v578_v49 = vld [vmem:[#allocation3 + $0x58] sm:$0xff]  ;;  %v576_v51 = vld [vmem:[#allocation3 + $0x30] sm:$0xff]  ;;  %v577_v57 = vld [vmem:[#allocation3] sm:$0xff] }
  0x1e   : > { %v579_v54 = vld [vmem:[#allocation3 + $0x18] sm:$0xff]  ;;  %v582_v60 = vld [vmem:[#allocation3 + $0x8] sm:$0xff]  ;;  %v580_v63 = vld [vmem:[#allocation3 + $0x50] sm:$0xff] }
  0x1f   : > { %1755 = vmatpush3.bf16.msra.mxu0 %v1905_v3  ;;  %v583_v2 = vld [vmem:[#allocation3 + $0x48] sm:$0xff]  ;;  %v585_v17 = vld [vmem:[#allocation3 + $0x20] sm:$0xff] }
  0x20   : > { %1756 = vmatprep.subr.bf16.mxu0 %v1906_v4  ;;  %v581_v5 = vld [vmem:[#allocation3 + $0x68] sm:$0xff] }
  0x23   : > { %1757 = vmatpush3.bf16.msra.mxu0 %v1906_v4 }
  0x24   : > { %1758 = vmatprep.subr.bf16.mxu0 %v1907_v6 }
  0x27   : > { %1759 = vmatpush3.bf16.msra.mxu0 %v1907_v6 }
  0x28   : > { %1760 = vmatprep.subr.bf16.mxu0 %v1908_v7 }
  0x2b   : > { %1761 = vmatpush3.bf16.msra.mxu0 %v1908_v7 }
  0x2c   : > { %1762 = vmatprep.subr.bf16.mxu0 %v1909_v8 }
  0x2f   : > { %1763 = vmatpush3.bf16.msra.mxu0 %v1909_v8  ;;  %v586_v8 = vld [vmem:[#allocation3 + $0x10] sm:$0xff] }
  0x30   : > { %1764 = vmatprep.subr.bf16.mxu0 %v1910_v9 }
  0x33   : > { %1765 = vmatpush3.bf16.msra.mxu0 %v1910_v9 }
  0x36   : > { %1767 = vmatmul.mubr.bf16.vlgmr.msra.gmra.mxu0 %v1912_v10 }
  0x37   : > { %1770 = vmatprep.mubr.bf16.mxu0 %v1913_v11  ;;  %v584_v11 = vld [vmem:[#allocation3 + $0x40] sm:$0xff] }
  0x3e   : > { %1771 = vmatmul.mubr.bf16.gmra.mxu0 %v1914_v12 }
  0x3f   : > { %1774 = vmatprep.mubr.bf16.mxu0 %v1915_v13 }
  0x46   : > { %1775 = vmatmul.mubr.bf16.gmra.mxu0 %v1916_v14  ;;  %v587_v14 = vld [vmem:[#allocation3 + $0x38] sm:$0xff] }
  0x47   : > { %1778 = vmatprep.mubr.bf16.mxu0 %v1917_v15 }
  0x4e   : > { %1779 = vmatmul.mubr.bf16.gmra.mxu0 %v1918_v16 }
  0xf6   : > { %v1768_v18 = vpop.f32.mrf.mxu0 }
  0xf8   : > { %v513_v19 = vpop.f32.mrf.mxu0 }
  0xfa   : > { %v1769_v20 = vpop.f32.mrf.mxu0 }
  0xfb   : > { %v609_v40 = vpack.c.bf16 %v1769_v20, %v1768_v18  ;;  %v590_v20 = vld [vmem:[#allocation3 + $0x78] sm:$0xff] }
  0xfc   : > { %v516_v21 = vpop.f32.mrf.mxu0 }
  0xfd   : > { %v608_v41 = vpack.c.bf16 %v516_v21, %v513_v19 }
  0xfe   : > { %v1772_v22 = vpop.f32.mrf.mxu0 }
 0x100   : > { %v529_v23 = vpop.f32.mrf.mxu0 }
 0x102   : > { %v1773_v24 = vpop.f32.mrf.mxu0 }
 0x103   : > { %v611_v38 = vpack.c.bf16 %v1773_v24, %v1772_v22 }
 0x104   : > { %v532_v25 = vpop.f32.mrf.mxu0 }
 0x105   : > { %v610_v39 = vpack.c.bf16 %v532_v25, %v529_v23  ;;  %v588_v23 = vld [vmem:[#allocation3 + $0x60] sm:$0xff] }
 0x106   : > { %v1776_v26 = vpop.f32.mrf.mxu0 }
 0x108   : > { %v545_v27 = vpop.f32.mrf.mxu0 }
 0x10a   : > { %v1777_v28 = vpop.f32.mrf.mxu0 }
 0x10b   : > { %v613_v36 = vpack.c.bf16 %v1777_v28, %v1776_v26  ;;  %v591_v26 = vld [vmem:[#allocation3 + $0x28] sm:$0xff] }
 0x10c   : > { %v548_v29 = vpop.f32.mrf.mxu0 }
 0x10d   : > { %v612_v37 = vpack.c.bf16 %v548_v29, %v545_v27  ;;  %v589_v29 = vld [vmem:[#allocation3 + $0x70] sm:$0xff] }
 0x10e   : > { %v1780_v30 = vpop.f32.mrf.mxu0 }
 0x110   : > { %v561_v31 = vpop.f32.mrf.mxu0 }
 0x112   : > { %v1781_v32 = vpop.f32.mrf.mxu0 }
 0x113   : > { %v615_v33 = vpack.c.bf16 %v1781_v32, %v1780_v30 }
 0x114   : > { %v564_v34 = vpop.f32.mrf.mxu0 }
 0x115   : > { %v614_v35 = vpack.c.bf16 %v564_v34, %v561_v31  ;;  %1782 = vmatprep.subr.bf16.mxu1 %v615_v33 }
 0x116   : > { %1783 = vmatpush3.bf16.msra.mxu1 %v615_v33 }
 0x117   : > { %1784 = vmatprep.subr.bf16.mxu1 %v614_v35 }
 0x11a   : > { %1785 = vmatpush3.bf16.msra.mxu1 %v614_v35 }
 0x11b   : > { %1786 = vmatprep.subr.bf16.mxu1 %v613_v36 }
 0x11e   : > { %1787 = vmatpush3.bf16.msra.mxu1 %v613_v36 }
 0x11f   : > { %1788 = vmatprep.subr.bf16.mxu1 %v612_v37 }
 0x122   : > { %1789 = vmatpush3.bf16.msra.mxu1 %v612_v37 }
 0x123   : > { %1790 = vmatprep.subr.bf16.mxu1 %v611_v38 }
 0x126   : > { %1791 = vmatpush3.bf16.msra.mxu1 %v611_v38 }
 0x127   : > { %1792 = vmatprep.subr.bf16.mxu1 %v610_v39 }
 0x12a   : > { %1793 = vmatpush3.bf16.msra.mxu1 %v610_v39 }
 0x12b   : > { %1794 = vmatprep.subr.bf16.mxu1 %v609_v40 }
 0x12e   : > { %1795 = vmatpush3.bf16.msra.mxu1 %v609_v40 }
 0x12f   : > { %1796 = vmatprep.subr.bf16.mxu1 %v608_v41 }
 0x132   : > { %1797 = vmatpush3.bf16.msra.mxu1 %v608_v41 }
 0x135   : > { %1799 = vmatmul.mubr.bf16.vlgmr.msra.gmra.mxu1 %v1920_v42 }
 0x136   : > { %1802 = vmatprep.mubr.bf16.mxu1 %v1921_v43 }
 0x13d   : > { %1803 = vmatmul.mubr.bf16.gmra.mxu1 %v1922_v44 }
 0x13e   : > { %1806 = vmatprep.mubr.bf16.mxu1 %v1923_v45 }
 0x145   : > { %1807 = vmatmul.mubr.bf16.gmra.mxu1 %v1924_v46 }
 0x146   : > { %1810 = vmatprep.mubr.bf16.mxu1 %v1925_v47 }
 0x14d   : > { %1811 = vmatmul.mubr.bf16.gmra.mxu1 %v1926_v48 }
 0x1f5   : > { %v1800_v50 = vpop.f32.mrf.mxu1 }
 0x1f6   : > { %v763_v52 = vadd.f32 %v1800_v50, %v578_v49 }
 0x1f7   : > { %v698_v53 = vpop.f32.mrf.mxu1 }
 0x1f8   : > { %779 = vst [vmem:[#allocation3 + $0x58] sm:$0xff] %v763_v52  ;;  %v761_v55 = vadd.f32 %v698_v53, %v576_v51 }
 0x1f9   : > { %v1801_v56 = vpop.f32.mrf.mxu1 }
 0x1fa   : > { %777 = vst [vmem:[#allocation3 + $0x30] sm:$0xff] %v761_v55  ;;  %v764_v58 = vadd.f32 %v1801_v56, %v579_v54 }
 0x1fb   : > { %v701_v59 = vpop.f32.mrf.mxu1 }
 0x1fc   : > { %780 = vst [vmem:[#allocation3 + $0x18] sm:$0xff] %v764_v58  ;;  %v762_v61 = vadd.f32 %v701_v59, %v577_v57 }
 0x1fd   : > { %v1804_v62 = vpop.f32.mrf.mxu1 }
 0x1fe   : > { %778 = vst [vmem:[#allocation3] sm:$0xff] %v762_v61  ;;  %v767_v0 = vadd.f32 %v1804_v62, %v582_v60 }
 0x1ff   : > { %v714_v1 = vpop.f32.mrf.mxu1 }
 0x200   : > { %783 = vst [vmem:[#allocation3 + $0x8] sm:$0xff] %v767_v0  ;;  %v765_v3 = vadd.f32 %v714_v1, %v580_v63 }
 0x201   : > { %v1805_v4 = vpop.f32.mrf.mxu1 }
 0x202   : > { %781 = vst [vmem:[#allocation3 + $0x50] sm:$0xff] %v765_v3  ;;  %v768_v6 = vadd.f32 %v1805_v4, %v583_v2 }
 0x203   : > { %v717_v7 = vpop.f32.mrf.mxu1 }
 0x204   : > { %784 = vst [vmem:[#allocation3 + $0x48] sm:$0xff] %v768_v6  ;;  %v766_v9 = vadd.f32 %v717_v7, %v581_v5 }
 0x205   : > { %v1808_v10 = vpop.f32.mrf.mxu1 }
 0x206   : > { %782 = vst [vmem:[#allocation3 + $0x68] sm:$0xff] %v766_v9  ;;  %v771_v12 = vadd.f32 %v1808_v10, %v586_v8 }
 0x207   : > { %v730_v13 = vpop.f32.mrf.mxu1 }
 0x208   : > { %787 = vst [vmem:[#allocation3 + $0x10] sm:$0xff] %v771_v12  ;;  %v769_v15 = vadd.f32 %v730_v13, %v584_v11 }
 0x209   : > { %v1809_v16 = vpop.f32.mrf.mxu1 }
 0x20a   : > { %785 = vst [vmem:[#allocation3 + $0x40] sm:$0xff] %v769_v15  ;;  %v772_v18 = vadd.f32 %v1809_v16, %v587_v14 }
 0x20b   : > { %v733_v19 = vpop.f32.mrf.mxu1 }
 0x20c   : > { %788 = vst [vmem:[#allocation3 + $0x38] sm:$0xff] %v772_v18  ;;  %v770_v21 = vadd.f32 %v733_v19, %v585_v17 }
 0x20d   : > { %v1812_v22 = vpop.f32.mrf.mxu1 }
 0x20e   : > { %786 = vst [vmem:[#allocation3 + $0x20] sm:$0xff] %v770_v21  ;;  %v775_v24 = vadd.f32 %v1812_v22, %v590_v20 }
 0x20f   : > { %v746_v25 = vpop.f32.mrf.mxu1 }
 0x210   : > { %791 = vst [vmem:[#allocation3 + $0x78] sm:$0xff] %v775_v24  ;;  %v773_v27 = vadd.f32 %v746_v25, %v588_v23 }
 0x211   : > { %v1813_v28 = vpop.f32.mrf.mxu1 }
 0x212   : > { %789 = vst [vmem:[#allocation3 + $0x60] sm:$0xff] %v773_v27  ;;  %v776_v30 = vadd.f32 %v1813_v28, %v591_v26 }
 0x213   : > { %v749_v31 = vpop.f32.mrf.mxu1 }
 0x214   : > { %792 = vst [vmem:[#allocation3 + $0x28] sm:$0xff] %v776_v30  ;;  %v774_v32 = vadd.f32 %v749_v31, %v589_v29 }
 0x216   : > { %790 = vst [vmem:[#allocation3 + $0x70] sm:$0xff] %v774_v32 }
 0x217 PF: > { %796 = sbr.rel (!%p347_p4) target bundleno = 552 (0x228), region = 56  ;;  %v797_v33 = vld [vmem:[#allocation3 + $0x30] sm:$0xff] (%p347_p4)  ;;  %v798_v34 = vld [vmem:[#allocation3] sm:$0xff] (%p347_p4)  ;;  %v799_v38 = vld [vmem:[#allocation3 + $0x58] sm:$0xff] (%p347_p4) }
 0x218   : > { %v1573_v35 = vld [vmem:[%s2226_s4] ss:$0 sm:$0xff] (%p347_p4)  ;;  %v800_v39 = vld [vmem:[#allocation3 + $0x18] sm:$0xff] (%p347_p4)  ;;  %v801_v40 = vld [vmem:[#allocation3 + $0x50] sm:$0xff] (%p347_p4) }
 0x219   : > { %v820_v36 = vadd.f32 (%p347_p4), %v1573_v35, %v797_v33  ;;  %v821_v37 = vadd.f32 (%p347_p4), %v1573_v35, %v798_v34  ;;  %v822_v41 = vadd.f32 (%p347_p4), %v1573_v35, %v799_v38  ;;  %v823_v42 = vadd.f32 (%p347_p4), %v1573_v35, %v800_v39  ;;  %v802_v43 = vld [vmem:[#allocation3 + $0x68] sm:$0xff] (%p347_p4) }
 0x21a   : > { %v824_v44 = vadd.f32 (%p347_p4), %v1573_v35, %v801_v40  ;;  %v803_v45 = vld [vmem:[#allocation3 + $0x8] sm:$0xff] (%p347_p4)  ;;  %v825_v49 = vadd.f32 (%p347_p4), %v1573_v35, %v802_v43  ;;  %v805_v51 = vld [vmem:[#allocation3 + $0x40] sm:$0xff] (%p347_p4) }
 0x21b   : > { %v804_v46 = vld [vmem:[#allocation3 + $0x48] sm:$0xff] (%p347_p4)  ;;  %v836_v47 = vmax.f32 (%p347_p4), %v820_v36, 0.0  ;;  %v837_v48 = vmax.f32 (%p347_p4), %v821_v37, 0.0  ;;  %v826_v50 = vadd.f32 (%p347_p4), %v1573_v35, %v803_v45  ;;  %v806_v52 = vld [vmem:[#allocation3 + $0x20] sm:$0xff] (%p347_p4)  ;;  %v807_v53 = vld [vmem:[#allocation3 + $0x10] sm:$0xff] (%p347_p4)  ;;  %v838_v54 = vmax.f32 (%p347_p4), %v822_v41, 0.0 }
 0x21c   : > { %v839_v55 = vmax.f32 %v823_v42, 0.0  ;;  %v840_v56 = vmax.f32 %v824_v44, 0.0  ;;  %v827_v57 = vadd.f32 %v1573_v35, %v804_v46  ;;  %v808_v58 = vld [vmem:[#allocation3 + $0x38] sm:$0xff]  ;;  %v809_v59 = vld [vmem:[#allocation3 + $0x60] sm:$0xff]  ;;  %v841_v61 = vmax.f32 %v825_v49, 0.0 }
 0x21d   : > { %v1642_v60 = vpack.c.bf16 %v837_v48, %v836_v47  ;;  %v842_v62 = vmax.f32 %v826_v50, 0.0  ;;  %v828_v63 = vadd.f32 %v1573_v35, %v805_v51  ;;  %v810_v0 = vld [vmem:[#allocation3 + $0x70] sm:$0xff]  ;;  %v829_v3 = vadd.f32 %v1573_v35, %v806_v52  ;;  %v811_v5 = vld [vmem:[#allocation3 + $0x78] sm:$0xff]  ;;  %v812_v6 = vld [vmem:[#allocation3 + $0x28] sm:$0xff] }
 0x21e   : > { %v1647_v1 = vpack.c.bf16 %v839_v55, %v838_v54  ;;  %v843_v2 = vmax.f32 %v827_v57, 0.0  ;;  %v830_v4 = vadd.f32 %v1573_v35, %v807_v53  ;;  %v1652_v7 = vpack.c.bf16 %v841_v61, %v840_v56 }
 0x21f   : > { %1643 = vst [vmem:[#allocation2] sm:$0xff] %v1642_v60   ;;  %v844_v8 = vmax.f32 %v828_v63, 0.0  ;;  %v831_v9 = vadd.f32 %v1573_v35, %v808_v58  ;;  %v832_v10 = vadd.f32 %v1573_v35, %v809_v59  ;;  %v845_v12 = vmax.f32 %v829_v3, 0.0 }
 0x220   : > { %1679 = vst [vmem:[#allocation2 + $0x8] sm:$0xff] %v1647_v1   ;;  %v1657_v11 = vpack.c.bf16 %v843_v2, %v842_v62  ;;  %v846_v13 = vmax.f32 %v830_v4, 0.0  ;;  %v833_v14 = vadd.f32 %v1573_v35, %v810_v0  ;;  %1680 = vst [vmem:[#allocation2 + $0x10] sm:$0xff] %v1652_v7   ;;  %v834_v17 = vadd.f32 %v1573_v35, %v811_v5 }
 0x221   : > { %v847_v15 = vmax.f32 %v831_v9, 0.0  ;;  %v848_v16 = vmax.f32 %v832_v10, 0.0  ;;  %v835_v18 = vadd.f32 %v1573_v35, %v812_v6  ;;  %v1662_v19 = vpack.c.bf16 %v845_v12, %v844_v8 }
 0x222   : > { %1681 = vst [vmem:[#allocation2 + $0x18] sm:$0xff] %v1657_v11   ;;  %v849_v20 = vmax.f32 %v833_v14, 0.0  ;;  %v850_v22 = vmax.f32 %v834_v17, 0.0 }
 0x223   : > { %v1667_v21 = vpack.c.bf16 %v847_v15, %v846_v13  ;;  %v851_v23 = vmax.f32 %v835_v18, 0.0  ;;  %1682 = vst [vmem:[#allocation2 + $0x20] sm:$0xff] %v1662_v19  }
 0x224   : > { %v1672_v24 = vpack.c.bf16 %v849_v20, %v848_v16 }
 0x225   : > { %1683 = vst [vmem:[#allocation2 + $0x28] sm:$0xff] %v1667_v21   ;;  %v1677_v25 = vpack.c.bf16 %v851_v23, %v850_v22 }
 0x226   : > { %1684 = vst [vmem:[#allocation2 + $0x30] sm:$0xff] %v1672_v24  }
 0x227   : > { %1685 = vst [vmem:[#allocation2 + $0x38] sm:$0xff] %v1677_v25  }
 0x228 PF: > { %p937_p6 = scmp.eq.s32.totalorder %s1965_s21, 1  ;;  %p1590_p7 = scmp.ne.s32.totalorder %s1965_s21, 1 }
 0x22a   : > { %940 = sbr.rel (%p1590_p7) target bundleno = 1073 (0x431), region = 60 }
 0x22f   : > { %v1927_v26 = vld [vmem:[%s2225_s3 + $0x38] sm:$0xff]   ;;  %v1928_v27 = vld [vmem:[%s2225_s3 + $0x30] sm:$0xff]   ;;  %v1929_v28 = vld [vmem:[%s2225_s3 + $0x28] sm:$0xff]  }
 0x230   : > { %1814 = vmatprep.subr.bf16.mxu0 %v1927_v26  ;;  %v1930_v29 = vld [vmem:[%s2225_s3 + $0x20] sm:$0xff]   ;;  %v1931_v31 = vld [vmem:[%s2225_s3 + $0x18] sm:$0xff]   ;;  %v1932_v32 = vld [vmem:[%s2225_s3 + $0x10] sm:$0xff]  }
 0x231   : > { %1815 = vmatpush3.bf16.msra.mxu0 %v1927_v26  ;;  %v1935_v30 = vld [vmem:[#allocation2] sm:$0xff]   ;;  %v1933_v33 = vld [vmem:[%s2225_s3 + $0x8] sm:$0xff]   ;;  %v1937_v36 = vld [vmem:[#allocation2 + $0x10] sm:$0xff]  }
 0x232   : > { %1816 = vmatprep.subr.bf16.mxu0 %v1928_v27  ;;  %1830 = vmatprep.mubr.bf16.mxu0 %v1935_v30  ;;  %v1934_v34 = vld [vmem:[%s2225_s3] sm:$0xff]   ;;  %v1936_v35 = vld [vmem:[#allocation2 + $0x8] sm:$0xff]   ;;  %v1938_v37 = vld [vmem:[#allocation2 + $0x18] sm:$0xff]  }
 0x233   : > { %v1939_v38 = vld [vmem:[#allocation2 + $0x20] sm:$0xff]   ;;  %v1940_v39 = vld [vmem:[#allocation2 + $0x28] sm:$0xff]   ;;  %v1941_v40 = vld [vmem:[#allocation2 + $0x30] sm:$0xff]  }
 0x234   : > { %v1942_v41 = vld [vmem:[#allocation2 + $0x38] sm:$0xff]   ;;  %v1943_v42 = vld [vmem:[%s2222_s0] sm:$0xff]   ;;  %v1944_v3 = vld [vmem:[%s2222_s0 + $0x8] sm:$0xff]  }
 0x235   : > { %1817 = vmatpush3.bf16.msra.mxu0 %v1928_v27  ;;  %1862 = vmatprep.mubr.bf16.mxu1 %v1943_v42  ;;  %v1945_v4 = vld [vmem:[%s2222_s0 + $0x10] sm:$0xff]   ;;  %v1946_v5 = vld [vmem:[%s2222_s0 + $0x18] sm:$0xff]   ;;  %v1947_v6 = vld [vmem:[%s2222_s0 + $0x20] sm:$0xff]  }
 0x236   : > { %1818 = vmatprep.subr.bf16.mxu0 %v1929_v28  ;;  %v1948_v7 = vld [vmem:[%s2222_s0 + $0x28] sm:$0xff]   ;;  %v1949_v8 = vld [vmem:[%s2222_s0 + $0x30] sm:$0xff]   ;;  %v1950_v9 = vld [vmem:[%s2222_s0 + $0x38] sm:$0xff]  }
 0x237   : > { %v1173_v10 = vld [vmem:[#allocation3 + $0x58] sm:$0xff]  ;;  %v1171_v12 = vld [vmem:[#allocation3 + $0x30] sm:$0xff]  ;;  %v1172_v18 = vld [vmem:[#allocation3] sm:$0xff] }
 0x238   : > { %v1174_v15 = vld [vmem:[#allocation3 + $0x18] sm:$0xff]  ;;  %v1177_v21 = vld [vmem:[#allocation3 + $0x8] sm:$0xff]  ;;  %v1175_v24 = vld [vmem:[#allocation3 + $0x50] sm:$0xff] }
 0x239   : > { %1819 = vmatpush3.bf16.msra.mxu0 %v1929_v28  ;;  %v1178_v27 = vld [vmem:[#allocation3 + $0x48] sm:$0xff]  ;;  %v1180_v42 = vld [vmem:[#allocation3 + $0x20] sm:$0xff] }
 0x23a   : > { %1820 = vmatprep.subr.bf16.mxu0 %v1930_v29  ;;  %v1176_v30 = vld [vmem:[#allocation3 + $0x68] sm:$0xff] }
 0x23d   : > { %1821 = vmatpush3.bf16.msra.mxu0 %v1930_v29 }
 0x23e   : > { %1822 = vmatprep.subr.bf16.mxu0 %v1931_v31 }
 0x241   : > { %1823 = vmatpush3.bf16.msra.mxu0 %v1931_v31 }
 0x242   : > { %1824 = vmatprep.subr.bf16.mxu0 %v1932_v32 }
 0x245   : > { %1825 = vmatpush3.bf16.msra.mxu0 %v1932_v32 }
 0x246   : > { %1826 = vmatprep.subr.bf16.mxu0 %v1933_v33 }
 0x249   : > { %1827 = vmatpush3.bf16.msra.mxu0 %v1933_v33  ;;  %v1181_v33 = vld [vmem:[#allocation3 + $0x10] sm:$0xff] }
 0x24a   : > { %1828 = vmatprep.subr.bf16.mxu0 %v1934_v34 }
 0x24d   : > { %1829 = vmatpush3.bf16.msra.mxu0 %v1934_v34 }
 0x250   : > { %1831 = vmatmul.mubr.bf16.vlgmr.msra.gmra.mxu0 %v1936_v35 }
 0x251   : > { %1834 = vmatprep.mubr.bf16.mxu0 %v1937_v36  ;;  %v1179_v36 = vld [vmem:[#allocation3 + $0x40] sm:$0xff] }
 0x258   : > { %1835 = vmatmul.mubr.bf16.gmra.mxu0 %v1938_v37 }
 0x259   : > { %1838 = vmatprep.mubr.bf16.mxu0 %v1939_v38 }
 0x260   : > { %1839 = vmatmul.mubr.bf16.gmra.mxu0 %v1940_v39  ;;  %v1182_v39 = vld [vmem:[#allocation3 + $0x38] sm:$0xff] }
 0x261   : > { %1842 = vmatprep.mubr.bf16.mxu0 %v1941_v40 }
 0x268   : > { %1843 = vmatmul.mubr.bf16.gmra.mxu0 %v1942_v41 }
 0x310   : > { %v1832_v43 = vpop.f32.mrf.mxu0 }
 0x312   : > { %v1108_v44 = vpop.f32.mrf.mxu0 }
 0x314   : > { %v1833_v45 = vpop.f32.mrf.mxu0 }
 0x315   : > { %v1204_v1 = vpack.c.bf16 %v1833_v45, %v1832_v43  ;;  %v1185_v45 = vld [vmem:[#allocation3 + $0x78] sm:$0xff] }
 0x316   : > { %v1111_v46 = vpop.f32.mrf.mxu0 }
 0x317   : > { %v1203_v2 = vpack.c.bf16 %v1111_v46, %v1108_v44 }
 0x318   : > { %v1836_v47 = vpop.f32.mrf.mxu0 }
 0x31a   : > { %v1124_v48 = vpop.f32.mrf.mxu0 }
 0x31c   : > { %v1837_v49 = vpop.f32.mrf.mxu0 }
 0x31d   : > { %v1206_v63 = vpack.c.bf16 %v1837_v49, %v1836_v47 }
 0x31e   : > { %v1127_v50 = vpop.f32.mrf.mxu0 }
 0x31f   : > { %v1205_v0 = vpack.c.bf16 %v1127_v50, %v1124_v48  ;;  %v1183_v48 = vld [vmem:[#allocation3 + $0x60] sm:$0xff] }
 0x320   : > { %v1840_v51 = vpop.f32.mrf.mxu0 }
 0x322   : > { %v1140_v52 = vpop.f32.mrf.mxu0 }
 0x324   : > { %v1841_v53 = vpop.f32.mrf.mxu0 }
 0x325   : > { %v1208_v61 = vpack.c.bf16 %v1841_v53, %v1840_v51  ;;  %v1186_v51 = vld [vmem:[#allocation3 + $0x28] sm:$0xff] }
 0x326   : > { %v1143_v54 = vpop.f32.mrf.mxu0 }
 0x327   : > { %v1207_v62 = vpack.c.bf16 %v1143_v54, %v1140_v52  ;;  %v1184_v54 = vld [vmem:[#allocation3 + $0x70] sm:$0xff] }
 0x328   : > { %v1844_v55 = vpop.f32.mrf.mxu0 }
 0x32a   : > { %v1156_v56 = vpop.f32.mrf.mxu0 }
 0x32c   : > { %v1845_v57 = vpop.f32.mrf.mxu0 }
 0x32d   : > { %v1210_v58 = vpack.c.bf16 %v1845_v57, %v1844_v55 }
 0x32e   : > { %v1159_v59 = vpop.f32.mrf.mxu0 }
 0x32f   : > { %v1209_v60 = vpack.c.bf16 %v1159_v59, %v1156_v56  ;;  %1846 = vmatprep.subr.bf16.mxu1 %v1210_v58 }
 0x330   : > { %1847 = vmatpush3.bf16.msra.mxu1 %v1210_v58 }
 0x331   : > { %1848 = vmatprep.subr.bf16.mxu1 %v1209_v60 }
 0x334   : > { %1849 = vmatpush3.bf16.msra.mxu1 %v1209_v60 }
 0x335   : > { %1850 = vmatprep.subr.bf16.mxu1 %v1208_v61 }
 0x338   : > { %1851 = vmatpush3.bf16.msra.mxu1 %v1208_v61 }
 0x339   : > { %1852 = vmatprep.subr.bf16.mxu1 %v1207_v62 }
 0x33c   : > { %1853 = vmatpush3.bf16.msra.mxu1 %v1207_v62 }
 0x33d   : > { %1854 = vmatprep.subr.bf16.mxu1 %v1206_v63 }
 0x340   : > { %1855 = vmatpush3.bf16.msra.mxu1 %v1206_v63 }
 0x341   : > { %1856 = vmatprep.subr.bf16.mxu1 %v1205_v0 }
 0x344   : > { %1857 = vmatpush3.bf16.msra.mxu1 %v1205_v0 }
 0x345   : > { %1858 = vmatprep.subr.bf16.mxu1 %v1204_v1 }
 0x348   : > { %1859 = vmatpush3.bf16.msra.mxu1 %v1204_v1 }
 0x349   : > { %1860 = vmatprep.subr.bf16.mxu1 %v1203_v2 }
 0x34c   : > { %1861 = vmatpush3.bf16.msra.mxu1 %v1203_v2 }
 0x34f   : > { %1863 = vmatmul.mubr.bf16.vlgmr.msra.gmra.mxu1 %v1944_v3 }
 0x350   : > { %1866 = vmatprep.mubr.bf16.mxu1 %v1945_v4 }
 0x357   : > { %1867 = vmatmul.mubr.bf16.gmra.mxu1 %v1946_v5 }
 0x358   : > { %1870 = vmatprep.mubr.bf16.mxu1 %v1947_v6 }
 0x35f   : > { %1871 = vmatmul.mubr.bf16.gmra.mxu1 %v1948_v7 }
 0x360   : > { %1874 = vmatprep.mubr.bf16.mxu1 %v1949_v8 }
 0x367   : > { %1875 = vmatmul.mubr.bf16.gmra.mxu1 %v1950_v9 }
 0x40f   : > { %v1864_v11 = vpop.f32.mrf.mxu1 }
 0x410   : > { %v1358_v13 = vadd.f32 %v1864_v11, %v1173_v10 }
 0x411   : > { %v1293_v14 = vpop.f32.mrf.mxu1 }
 0x412   : > { %1374 = vst [vmem:[#allocation3 + $0x58] sm:$0xff] %v1358_v13  ;;  %v1356_v16 = vadd.f32 %v1293_v14, %v1171_v12 }
 0x413   : > { %v1865_v17 = vpop.f32.mrf.mxu1 }
 0x414   : > { %1372 = vst [vmem:[#allocation3 + $0x30] sm:$0xff] %v1356_v16  ;;  %v1359_v19 = vadd.f32 %v1865_v17, %v1174_v15 }
 0x415   : > { %v1296_v20 = vpop.f32.mrf.mxu1 }
 0x416   : > { %1375 = vst [vmem:[#allocation3 + $0x18] sm:$0xff] %v1359_v19  ;;  %v1357_v22 = vadd.f32 %v1296_v20, %v1172_v18 }
 0x417   : > { %v1868_v23 = vpop.f32.mrf.mxu1 }
 0x418   : > { %1373 = vst [vmem:[#allocation3] sm:$0xff] %v1357_v22  ;;  %v1362_v25 = vadd.f32 %v1868_v23, %v1177_v21 }
 0x419   : > { %v1309_v26 = vpop.f32.mrf.mxu1 }
 0x41a   : > { %1378 = vst [vmem:[#allocation3 + $0x8] sm:$0xff] %v1362_v25  ;;  %v1360_v28 = vadd.f32 %v1309_v26, %v1175_v24 }
 0x41b   : > { %v1869_v29 = vpop.f32.mrf.mxu1 }
 0x41c   : > { %1376 = vst [vmem:[#allocation3 + $0x50] sm:$0xff] %v1360_v28  ;;  %v1363_v31 = vadd.f32 %v1869_v29, %v1178_v27 }
 0x41d   : > { %v1312_v32 = vpop.f32.mrf.mxu1 }
 0x41e   : > { %1379 = vst [vmem:[#allocation3 + $0x48] sm:$0xff] %v1363_v31  ;;  %v1361_v34 = vadd.f32 %v1312_v32, %v1176_v30 }
 0x41f   : > { %v1872_v35 = vpop.f32.mrf.mxu1 }
 0x420   : > { %1377 = vst [vmem:[#allocation3 + $0x68] sm:$0xff] %v1361_v34  ;;  %v1366_v37 = vadd.f32 %v1872_v35, %v1181_v33 }
 0x421   : > { %v1325_v38 = vpop.f32.mrf.mxu1 }
 0x422   : > { %1382 = vst [vmem:[#allocation3 + $0x10] sm:$0xff] %v1366_v37  ;;  %v1364_v40 = vadd.f32 %v1325_v38, %v1179_v36 }
 0x423   : > { %v1873_v41 = vpop.f32.mrf.mxu1 }
 0x424   : > { %1380 = vst [vmem:[#allocation3 + $0x40] sm:$0xff] %v1364_v40  ;;  %v1367_v43 = vadd.f32 %v1873_v41, %v1182_v39 }
 0x425   : > { %v1328_v44 = vpop.f32.mrf.mxu1 }
 0x426   : > { %1383 = vst [vmem:[#allocation3 + $0x38] sm:$0xff] %v1367_v43  ;;  %v1365_v46 = vadd.f32 %v1328_v44, %v1180_v42 }
 0x427   : > { %v1876_v47 = vpop.f32.mrf.mxu1 }
 0x428   : > { %1381 = vst [vmem:[#allocation3 + $0x20] sm:$0xff] %v1365_v46  ;;  %v1370_v49 = vadd.f32 %v1876_v47, %v1185_v45 }
 0x429   : > { %v1341_v50 = vpop.f32.mrf.mxu1 }
 0x42a   : > { %1386 = vst [vmem:[#allocation3 + $0x78] sm:$0xff] %v1370_v49  ;;  %v1368_v52 = vadd.f32 %v1341_v50, %v1183_v48 }
 0x42b   : > { %v1877_v53 = vpop.f32.mrf.mxu1 }
 0x42c   : > { %1384 = vst [vmem:[#allocation3 + $0x60] sm:$0xff] %v1368_v52  ;;  %v1371_v55 = vadd.f32 %v1877_v53, %v1186_v51 }
 0x42d   : > { %v1344_v56 = vpop.f32.mrf.mxu1 }
 0x42e   : > { %1387 = vst [vmem:[#allocation3 + $0x28] sm:$0xff] %v1371_v55  ;;  %v1369_v57 = vadd.f32 %v1344_v56, %v1184_v54 }
 0x430   : > { %1385 = vst [vmem:[#allocation3 + $0x70] sm:$0xff] %v1369_v57 }
 0x431 PF: > { %1391 = sbr.rel (!%p937_p6) target bundleno = 1084 (0x43c), region = 64  ;;  %v1392_v58 = vld [vmem:[#allocation3 + $0x30] sm:$0xff] (%p937_p6)  ;;  %v1616_v59 = vld [vmem:[%s2227_s5] ss:$0 sm:$0xff] (%p937_p6)  ;;  %v1394_v63 = vld [vmem:[#allocation3 + $0x58] sm:$0xff] (%p937_p6) }
 0x432   : > { %v1393_v60 = vld [vmem:[#allocation3] sm:$0xff] (%p937_p6)  ;;  %v1415_v61 = vadd.f32 (%p937_p6), %v1616_v59, %v1392_v58  ;;  %v1395_v0 = vld [vmem:[#allocation3 + $0x18] sm:$0xff] (%p937_p6)  ;;  %v1396_v1 = vld [vmem:[#allocation3 + $0x50] sm:$0xff] (%p937_p6)  ;;  %v1417_v2 = vadd.f32 (%p937_p6), %v1616_v59, %v1394_v63 }
 0x433   : > { %v1416_v62 = vadd.f32 (%p937_p6), %v1616_v59, %v1393_v60  ;;  %v1418_v3 = vadd.f32 (%p937_p6), %v1616_v59, %v1395_v0  ;;  %v1419_v4 = vadd.f32 (%p937_p6), %v1616_v59, %v1396_v1  ;;  %v1397_v5 = vld [vmem:[#allocation3 + $0x68] sm:$0xff] (%p937_p6)  ;;  %v1400_v11 = vld [vmem:[#allocation3 + $0x40] sm:$0xff] (%p937_p6)  ;;  %v1402_v13 = vld [vmem:[#allocation3 + $0x10] sm:$0xff] (%p937_p6) }
 0x434   : > { %v1398_v6 = vld [vmem:[#allocation3 + $0x8] sm:$0xff] (%p937_p6)  ;;  %1431 = vst [vmem:[%s2228_s6] sm:$0xff] (%p937_p6), %v1415_v61  ;;  %v1420_v8 = vadd.f32 (%p937_p6), %v1616_v59, %v1397_v5  ;;  %v1401_v12 = vld [vmem:[#allocation3 + $0x20] sm:$0xff] (%p937_p6)  ;;  %1433 = vst [vmem:[%s2228_s6 + $0x10] sm:$0xff] (%p937_p6), %v1417_v2  ;;  %v1423_v14 = vadd.f32 (%p937_p6), %v1616_v59, %v1400_v11  ;;  %v1425_v16 = vadd.f32 (%p937_p6), %v1616_v59, %v1402_v13 }
 0x435   : > { %v1399_v7 = vld [vmem:[#allocation3 + $0x48] sm:$0xff] (%p937_p6)  ;;  %1432 = vst [vmem:[%s2228_s6 + $0x8] sm:$0xff] (%p937_p6), %v1416_v62  ;;  %v1421_v9 = vadd.f32 (%p937_p6), %v1616_v59, %v1398_v6  ;;  %1434 = vst [vmem:[%s2228_s6 + $0x18] sm:$0xff] (%p937_p6), %v1418_v3  ;;  %v1424_v15 = vadd.f32 (%p937_p6), %v1616_v59, %v1401_v12  ;;  %v1403_v17 = vld [vmem:[#allocation3 + $0x38] sm:$0xff] (%p937_p6) }
 0x436   : > { %v1422_v10 = vadd.f32 %v1616_v59, %v1399_v7  ;;  %1435 = vst [vmem:[%s2228_s6 + $0x20] sm:$0xff] %v1419_v4  ;;  %v1404_v18 = vld [vmem:[#allocation3 + $0x60] sm:$0xff]  ;;  %1436 = vst [vmem:[%s2228_s6 + $0x28] sm:$0xff] %v1420_v8  ;;  %v1426_v20 = vadd.f32 %v1616_v59, %v1403_v17  ;;  %v1406_v23 = vld [vmem:[#allocation3 + $0x78] sm:$0xff] }
 0x437   : > { %v1405_v19 = vld [vmem:[#allocation3 + $0x70] sm:$0xff]  ;;  %1437 = vst [vmem:[%s2228_s6 + $0x30] sm:$0xff] %v1421_v9  ;;  %v1427_v21 = vadd.f32 %v1616_v59, %v1404_v18  ;;  %v1407_v24 = vld [vmem:[#allocation3 + $0x28] sm:$0xff]  ;;  %1439 = vst [vmem:[%s2228_s6 + $0x40] sm:$0xff] %v1423_v14  ;;  %v1429_v25 = vadd.f32 %v1616_v59, %v1406_v23 }
 0x438   : > { %1438 = vst [vmem:[%s2228_s6 + $0x38] sm:$0xff] %v1422_v10  ;;  %v1428_v22 = vadd.f32 %v1616_v59, %v1405_v19  ;;  %1440 = vst [vmem:[%s2228_s6 + $0x48] sm:$0xff] %v1424_v15  ;;  %v1430_v26 = vadd.f32 %v1616_v59, %v1407_v24 }
 0x439   : > { %1441 = vst [vmem:[%s2228_s6 + $0x50] sm:$0xff] %v1425_v16  ;;  %1442 = vst [vmem:[%s2228_s6 + $0x58] sm:$0xff] %v1426_v20 }
 0x43a   : > { %1443 = vst [vmem:[%s2228_s6 + $0x60] sm:$0xff] %v1427_v21  ;;  %1444 = vst [vmem:[%s2228_s6 + $0x68] sm:$0xff] %v1428_v22 }
 0x43b   : > { %1445 = vst [vmem:[%s2228_s6 + $0x70] sm:$0xff] %v1429_v25  ;;  %1446 = vst [vmem:[%s2228_s6 + $0x78] sm:$0xff] %v1430_v26 }
 0x43c PF: > { %s16_s23 = sadd.s32 1, %s1973_s23   ;;  %s2229_s21 = smov %s1969_s22 }
 0x43d   : > { %p13_p8 = scmp.ge.s32.totalorder %s16_s23, 4   ;;  %s2230_s22 = smov %s2232_s24 }
 0x43f   :  { %15 = sbr.rel (!%p13_p8) target bundleno = 2 (0x2), region = 99 }

</bundles_post_ra>
